<compile_context>
chip_gen: v6e
topology: v6e:2x2x1
jax: 0.10.0
libtpu: 0.0.40
codegen_flags: <defaults>
</compile_context>

<pallas_src>
import functools

import jax
import jax.numpy as jnp
from jax import lax
from jax.experimental import pallas as pl
from jax.experimental.pallas import tpu as pltpu


# ---------------------------------------------------------------------------
# Kernel: one grid step per (batch, head); output projection accumulated.
# ---------------------------------------------------------------------------

def _mha_kernel(x_ref, wq_ref, bq_ref, wk_ref, bk_ref, wv_ref, bv_ref,
                wo_ref, bo_ref, o_ref, acc_ref, *, scaling):
    h = pl.program_id(1)

    @pl.when(h == 0)
    def _():
        acc_ref[...] = jnp.zeros_like(acc_ref)

    x = x_ref[0]                       # (N, E), matmul dtype (bf16 or f32)
    cdt = x.dtype                      # MXU operand dtype
    wq = wq_ref[0]                     # (E, D)
    wk = wk_ref[0]
    wv = wv_ref[0]
    wo = wo_ref[0]                     # (D, E)

    # Per-head projections (f32 accumulation, f32 bias add).
    q = jnp.dot(x, wq, preferred_element_type=jnp.float32) + bq_ref[0]   # (N, D)
    k = jnp.dot(x, wk, preferred_element_type=jnp.float32) + bk_ref[0]   # (N, D)
    v = jnp.dot(x, wv, preferred_element_type=jnp.float32) + bv_ref[0]   # (N, D)

    # energy = q @ k^T, contraction on D (no explicit transpose of k).
    s = lax.dot_general(q.astype(cdt), k.astype(cdt),
                        (((1,), (1,)), ((), ())),
                        preferred_element_type=jnp.float32)              # (N, N)

    # NOTE: reference mask is a no-op (masked_fill result discarded) -> no mask.
    # Softmax over the last axis, kept in f32; reciprocal on the EUP.
    m = jnp.max(s, axis=-1, keepdims=True)
    e = jnp.exp(s - m)
    inv = pl.reciprocal(jnp.sum(e, axis=-1, keepdims=True), approx=True)
    att = e * inv                                                        # (N, N)

    # out_h = (softmax(s) * scaling) @ v_h ; scalar scaling folded into (N, D).
    oh = lax.dot_general(att.astype(cdt), v.astype(cdt),
                         (((1,), (0,)), ((), ())),
                         preferred_element_type=jnp.float32)             # (N, D)
    oh = oh * scaling

    # K-split of the output projection: acc += out_h @ Wo[h*D:(h+1)*D, :].
    # Lane-dense full-width (N, E) accumulation every head (no masked stores).
    acc_ref[...] += jnp.dot(oh.astype(cdt), wo,
                            preferred_element_type=jnp.float32)          # (N, E)

    @pl.when(h == pl.num_programs(1) - 1)
    def _():
        o_ref[0] = (acc_ref[...] + bo_ref[...]).astype(o_ref.dtype)


# ---------------------------------------------------------------------------
# Host-side parameter preparation (done ONCE, not per forward call).
# ---------------------------------------------------------------------------

def prepare_params(params, num_heads, matmul_dtype=jnp.bfloat16):
    """Split (E,E) nn.Linear weights per head and cast to the matmul dtype."""
    E = params["wq"].shape[0]
    D = E // num_heads

    def split_w(w):                     # (E, E) -> (H, E, D); col index = h*D + d
        return jnp.transpose(w.reshape(E, num_heads, D), (1, 0, 2)).astype(matmul_dtype)

    def split_b(b):                     # (E,) -> (H, 1, D), kept in f32
        return b.reshape(num_heads, 1, D).astype(jnp.float32)

    return {
        "wq3": split_w(params["wq"]), "bq3": split_b(params["bq"]),
        "wk3": split_w(params["wk"]), "bk3": split_b(params["bk"]),
        "wv3": split_w(params["wv"]), "bv3": split_b(params["bv"]),
        # Wo rows are indexed by (h d) -> (H, D, E)
        "wo3": params["wo"].reshape(num_heads, D, E).astype(matmul_dtype),
        "bo": params["bo"].reshape(1, E).astype(jnp.float32),
    }


def multi_head_attention(x, prepared, num_heads):
    """x: (B, N, E). `prepared` = prepare_params(...); matmul dtype is taken
    from the prepared weights (bf16 by default, f32 for bit-closer runs)."""
    B, N, E = x.shape
    D = E // num_heads
    scaling = float(D) ** (-0.5)
    out_dtype = x.dtype

    cdt = prepared["wq3"].dtype
    xm = x.astype(cdt)                  # cast once at the call boundary
    itm = jnp.dtype(cdt).itemsize

    # Advisory cost estimate for XLA scheduling around the custom call.
    flops = int(2 * B * num_heads * N * D * (4 * E + 2 * N))
    transcendentals = int(B * num_heads * N * N)
    weight_bytes = sum(int(v.size) * v.dtype.itemsize for v in prepared.values())
    bytes_accessed = int(B * N * E * itm            # x
                         + B * weight_bytes         # per-head weight streams
                         + B * N * E * jnp.dtype(out_dtype).itemsize)

    # Explicit VMEM bound from the per-step working set (double-buffered blocks
    # + f32 accumulator + softmax temporaries), clamped to v7x's 64 MiB.
    est = (2 * N * E * itm                                   # x block
           + 2 * N * E * jnp.dtype(out_dtype).itemsize       # out block
           + 2 * 2 * (3 * E * D + D * E) * itm               # per-head weights
           + N * E * 4                                        # acc scratch
           + 3 * N * N * 4                                    # s / e / att
           + 6 * N * D * 4)                                   # q / k / v / oh
    vmem_limit = max(32 << 20, min(2 * est + (2 << 20), 64 << 20))

    kern = functools.partial(_mha_kernel, scaling=scaling)

    return pl.pallas_call(
        kern,
        out_shape=jax.ShapeDtypeStruct((B, N, E), out_dtype),
        grid=(B, num_heads),
        in_specs=[
            pl.BlockSpec((1, N, E), lambda b, h: (b, 0, 0)),   # x (per-batch)
            pl.BlockSpec((1, E, D), lambda b, h: (h, 0, 0)),   # Wq head slice
            pl.BlockSpec((1, 1, D), lambda b, h: (h, 0, 0)),   # bq head slice
            pl.BlockSpec((1, E, D), lambda b, h: (h, 0, 0)),   # Wk head slice
            pl.BlockSpec((1, 1, D), lambda b, h: (h, 0, 0)),   # bk head slice
            pl.BlockSpec((1, E, D), lambda b, h: (h, 0, 0)),   # Wv head slice
            pl.BlockSpec((1, 1, D), lambda b, h: (h, 0, 0)),   # bv head slice
            pl.BlockSpec((1, D, E), lambda b, h: (h, 0, 0)),   # Wo head slice
            pl.BlockSpec((1, E), lambda b, h: (0, 0)),         # bo
        ],
        out_specs=pl.BlockSpec((1, N, E), lambda b, h: (b, 0, 0)),
        scratch_shapes=[pltpu.VMEM((N, E), jnp.float32)],      # f32 accumulator
        compiler_params=pltpu.CompilerParams(
            dimension_semantics=("parallel", "arbitrary"),     # batch || heads Σ
            vmem_limit_bytes=int(vmem_limit),
        ),
        cost_estimate=pl.CostEstimate(
            flops=flops, transcendentals=transcendentals,
            bytes_accessed=bytes_accessed),
    )(xm, prepared["wq3"], prepared["bq3"], prepared["wk3"], prepared["bk3"],
      prepared["wv3"], prepared["bv3"], prepared["wo3"], prepared["bo"])


# ---------------------------------------------------------------------------
# Params (nn.Linear weights stored transposed: (in, out)) and reference check.
# ---------------------------------------------------------------------------

def init_params(key, emb_size):
    keys = jax.random.split(key, 8)
    scale = 1.0 / jnp.sqrt(emb_size)

    def w(k):
        return jax.random.normal(k, (emb_size, emb_size), jnp.float32) * scale

    def b(k):
        return jax.random.normal(k, (emb_size,), jnp.float32) * scale

    return {
        "wq": w(keys[0]), "bq": b(keys[1]),
        "wk": w(keys[2]), "bk": b(keys[3]),
        "wv": w(keys[4]), "bv": b(keys[5]),
        "wo": w(keys[6]), "bo": b(keys[7]),
    }


def _reference(x, params, num_heads):
    """Pure-JAX mirror of the PyTorch forward (mask no-op, scaling post-softmax)."""
    B, N, E = x.shape
    D = E // num_heads
    scaling = float(D) ** (-0.5)

    def lin(t, w, b):
        return t @ w + b

    def split(t):
        return t.reshape(B, N, num_heads, D).transpose(0, 2, 1, 3)

    q = split(lin(x, params["wq"], params["bq"]))
    k = split(lin(x, params["wk"], params["bk"]))
    v = split(lin(x, params["wv"], params["bv"]))
    energy = jnp.einsum("bhqd,bhkd->bhqk", q, k)
    att = jax.nn.softmax(energy, axis=-1) * scaling
    out = jnp.einsum("bhal,bhlv->bhav", att, v)
    out = out.transpose(0, 2, 1, 3).reshape(B, N, E)
    return lin(out, params["wo"], params["bo"])


if __name__ == "__main__":
    B, N, E, H = 2, 8, 32, 8   # batch, tokens, emb_size, heads -> head_dim = 4

    key = jax.random.PRNGKey(0)
    k_x, k_p = jax.random.split(key)
    x = jax.random.normal(k_x, (B, N, E), jnp.float32)
    params = init_params(k_p, E)
    ref = _reference(x, params, H)

    # bf16 matmul path (default / perf path: v5e, v6e, v7x MXU-rate).
    prep_bf16 = prepare_params(params, H, matmul_dtype=jnp.bfloat16)
    out_bf16 = multi_head_attention(x, prep_bf16, H)
    jax.block_until_ready(out_bf16)
    assert out_bf16.shape == (B, N, E)
    assert jnp.allclose(out_bf16, ref, rtol=5e-2, atol=5e-2), "bf16 path mismatch"

    # f32 matmul path (near-exact semantics; only approx-reciprocal error).
    prep_f32 = prepare_params(params, H, matmul_dtype=jnp.float32)
    out_f32 = multi_head_attention(x, prep_f32, H)
    jax.block_until_ready(out_f32)
    assert jnp.allclose(out_f32, ref, rtol=5e-3, atol=5e-3), "f32 path mismatch"

    print("KERNEL_OK")
</pallas_src>

<mosaic_0001>
module attributes {stable_mosaic.version = 11 : i64} {
  func.func @_mha_kernel(%arg0: i32, %arg1: i32, %arg2: memref<1x8x32xbf16, #tpu.memory_space<vmem>>, %arg3: memref<1x32x4xbf16, #tpu.memory_space<vmem>>, %arg4: memref<1x1x4xf32, #tpu.memory_space<vmem>>, %arg5: memref<1x32x4xbf16, #tpu.memory_space<vmem>>, %arg6: memref<1x1x4xf32, #tpu.memory_space<vmem>>, %arg7: memref<1x32x4xbf16, #tpu.memory_space<vmem>>, %arg8: memref<1x1x4xf32, #tpu.memory_space<vmem>>, %arg9: memref<1x4x32xbf16, #tpu.memory_space<vmem>>, %arg10: memref<1x32xf32, #tpu.memory_space<vmem>>, %arg11: memref<1x8x32xf32, #tpu.memory_space<vmem>>, %arg12: memref<8x32xf32, #tpu.memory_space<vmem>>) attributes {dimension_semantics = [#tpu.dimension_semantics<parallel>, #tpu.dimension_semantics<arbitrary>], iteration_bounds = array<i64: 2, 8>, scalar_prefetch = 0 : i64, scratch_operands = 1 : i64, tpu.core_type = #tpu.core_type<tc>, window_params = [{transform_indices = @transform_0, window_bounds = array<i64: 1, 8, 32>}, {transform_indices = @transform_1, window_bounds = array<i64: 1, 32, 4>}, {transform_indices = @transform_2, window_bounds = array<i64: 1, 1, 4>}, {transform_indices = @transform_3, window_bounds = array<i64: 1, 32, 4>}, {transform_indices = @transform_4, window_bounds = array<i64: 1, 1, 4>}, {transform_indices = @transform_5, window_bounds = array<i64: 1, 32, 4>}, {transform_indices = @transform_6, window_bounds = array<i64: 1, 1, 4>}, {transform_indices = @transform_7, window_bounds = array<i64: 1, 4, 32>}, {pipeline_mode = #tpu.pipeline_mode<synchronous>, transform_indices = @transform_8, window_bounds = array<i64: 1, 32>}, {transform_indices = @transform_9, window_bounds = array<i64: 1, 8, 32>}]} {
    %c0_i32 = arith.constant 0 : i32
    %0 = arith.cmpi eq, %arg1, %c0_i32 : i32
    %1 = arith.extui %0 : i1 to i32
    %c0_i32_0 = arith.constant 0 : i32
    %2 = arith.cmpi ne, %1, %c0_i32_0 : i32
    scf.if %2 {
      %cst_37 = arith.constant 0.000000e+00 : f32
      %54 = vector.broadcast %cst_37 : f32 to vector<8x32xf32>
      %c0_38 = arith.constant 0 : index
      %c0_39 = arith.constant 0 : index
      %55 = vector.load %arg12[%c0_38, %c0_39] : memref<8x32xf32, #tpu.memory_space<vmem>>, vector<8x32xf32>
      tpu.vector_store %arg12[%c0_38, %c0_39], %54 {strides = array<i32>} : memref<8x32xf32, #tpu.memory_space<vmem>>, vector<8x32xf32>,
    } else {
    }
    %c0 = arith.constant 0 : index
    %c0_1 = arith.constant 0 : index
    %c0_2 = arith.constant 0 : index
    %3 = vector.load %arg2[%c0, %c0_1, %c0_2] : memref<1x8x32xbf16, #tpu.memory_space<vmem>>, vector<1x8x32xbf16>
    %4 = vector.shape_cast %3 : vector<1x8x32xbf16> to vector<8x32xbf16>
    %c0_3 = arith.constant 0 : index
    %c0_4 = arith.constant 0 : index
    %c0_5 = arith.constant 0 : index
    %5 = vector.load %arg3[%c0_3, %c0_4, %c0_5] : memref<1x32x4xbf16, #tpu.memory_space<vmem>>, vector<1x32x4xbf16>
    %6 = vector.shape_cast %5 : vector<1x32x4xbf16> to vector<32x4xbf16>
    %c0_6 = arith.constant 0 : index
    %c0_7 = arith.constant 0 : index
    %c0_8 = arith.constant 0 : index
    %7 = vector.load %arg5[%c0_6, %c0_7, %c0_8] : memref<1x32x4xbf16, #tpu.memory_space<vmem>>, vector<1x32x4xbf16>
    %8 = vector.shape_cast %7 : vector<1x32x4xbf16> to vector<32x4xbf16>
    %c0_9 = arith.constant 0 : index
    %c0_10 = arith.constant 0 : index
    %c0_11 = arith.constant 0 : index
    %9 = vector.load %arg7[%c0_9, %c0_10, %c0_11] : memref<1x32x4xbf16, #tpu.memory_space<vmem>>, vector<1x32x4xbf16>
    %10 = vector.shape_cast %9 : vector<1x32x4xbf16> to vector<32x4xbf16>
    %c0_12 = arith.constant 0 : index
    %c0_13 = arith.constant 0 : index
    %c0_14 = arith.constant 0 : index
    %11 = vector.load %arg9[%c0_12, %c0_13, %c0_14] : memref<1x4x32xbf16, #tpu.memory_space<vmem>>, vector<1x4x32xbf16>
    %12 = vector.shape_cast %11 : vector<1x4x32xbf16> to vector<4x32xbf16>
    %cst = arith.constant dense<0.000000e+00> : vector<8x4xf32>
    %13 = tpu.matmul %4, %6, %cst {dimension_numbers = #tpu.dot_dimension_numbers<[1], [0], [0], [1], [0, 0, 1, 1], [], []>} : vector<8x32xbf16>, vector<32x4xbf16>, vector<8x4xf32> -> vector<8x4xf32>
    %c0_15 = arith.constant 0 : index
    %c0_16 = arith.constant 0 : index
    %c0_17 = arith.constant 0 : index
    %14 = vector.load %arg4[%c0_15, %c0_16, %c0_17] : memref<1x1x4xf32, #tpu.memory_space<vmem>>, vector<1x1x4xf32>
    %15 = vector.shape_cast %14 : vector<1x1x4xf32> to vector<1x4xf32>
    %16 = vector.broadcast %15 : vector<1x4xf32> to vector<8x4xf32>
    %17 = arith.addf %13, %16 : vector<8x4xf32>
    %cst_18 = arith.constant dense<0.000000e+00> : vector<8x4xf32>
    %18 = tpu.matmul %4, %8, %cst_18 {dimension_numbers = #tpu.dot_dimension_numbers<[1], [0], [0], [1], [0, 0, 1, 1], [], []>} : vector<8x32xbf16>, vector<32x4xbf16>, vector<8x4xf32> -> vector<8x4xf32>
    %c0_19 = arith.constant 0 : index
    %c0_20 = arith.constant 0 : index
    %c0_21 = arith.constant 0 : index
    %19 = vector.load %arg6[%c0_19, %c0_20, %c0_21] : memref<1x1x4xf32, #tpu.memory_space<vmem>>, vector<1x1x4xf32>
    %20 = vector.shape_cast %19 : vector<1x1x4xf32> to vector<1x4xf32>
    %21 = vector.broadcast %20 : vector<1x4xf32> to vector<8x4xf32>
    %22 = arith.addf %18, %21 : vector<8x4xf32>
    %cst_22 = arith.constant dense<0.000000e+00> : vector<8x4xf32>
    %23 = tpu.matmul %4, %10, %cst_22 {dimension_numbers = #tpu.dot_dimension_numbers<[1], [0], [0], [1], [0, 0, 1, 1], [], []>} : vector<8x32xbf16>, vector<32x4xbf16>, vector<8x4xf32> -> vector<8x4xf32>
    %c0_23 = arith.constant 0 : index
    %c0_24 = arith.constant 0 : index
    %c0_25 = arith.constant 0 : index
    %24 = vector.load %arg8[%c0_23, %c0_24, %c0_25] : memref<1x1x4xf32, #tpu.memory_space<vmem>>, vector<1x1x4xf32>
    %25 = vector.shape_cast %24 : vector<1x1x4xf32> to vector<1x4xf32>
    %26 = vector.broadcast %25 : vector<1x4xf32> to vector<8x4xf32>
    %27 = arith.addf %23, %26 : vector<8x4xf32>
    %28 = arith.truncf %17 : vector<8x4xf32> to vector<8x4xbf16>
    %29 = arith.truncf %22 : vector<8x4xf32> to vector<8x4xbf16>
    %cst_26 = arith.constant dense<0.000000e+00> : vector<8x8xf32>
    %30 = tpu.matmul %28, %29, %cst_26 {dimension_numbers = #tpu.dot_dimension_numbers<[1], [1], [0], [0], [0, 0, 1, 0], [], []>} : vector<8x4xbf16>, vector<8x4xbf16>, vector<8x8xf32> -> vector<8x8xf32>
    %cst_27 = arith.constant dense<0xFF800000> : vector<8xf32>
    %31 = vector.multi_reduction <maximumf>, %30, %cst_27 [1] : vector<8x8xf32> to vector<8xf32>
    %32 = vector.shape_cast %31 : vector<8xf32> to vector<8x1xf32>
    %33 = vector.broadcast %32 : vector<8x1xf32> to vector<8x8xf32>
    %34 = arith.subf %30, %33 : vector<8x8xf32>
    %35 = math.exp %34 : vector<8x8xf32>
    %cst_28 = arith.constant dense<0.000000e+00> : vector<8xf32>
    %36 = vector.multi_reduction <add>, %35, %cst_28 [1] : vector<8x8xf32> to vector<8xf32>
    %37 = vector.shape_cast %36 : vector<8xf32> to vector<8x1xf32>
    %38 = tpu.reciprocal %37 {approx = true} : vector<8x1xf32> -> vector<8x1xf32>
    %39 = vector.broadcast %38 : vector<8x1xf32> to vector<8x8xf32>
    %40 = arith.mulf %35, %39 : vector<8x8xf32>
    %41 = arith.truncf %40 : vector<8x8xf32> to vector<8x8xbf16>
    %42 = arith.truncf %27 : vector<8x4xf32> to vector<8x4xbf16>
    %cst_29 = arith.constant dense<0.000000e+00> : vector<8x4xf32>
    %43 = tpu.matmul %41, %42, %cst_29 {dimension_numbers = #tpu.dot_dimension_numbers<[1], [0], [0], [1], [0, 0, 1, 1], [], []>} : vector<8x8xbf16>, vector<8x4xbf16>, vector<8x4xf32> -> vector<8x4xf32>
    %cst_30 = arith.constant 5.000000e-01 : f32
    %44 = vector.broadcast %cst_30 : f32 to vector<8x4xf32>
    %45 = arith.mulf %43, %44 : vector<8x4xf32>
    %c0_31 = arith.constant 0 : index
    %c0_32 = arith.constant 0 : index
    %46 = vector.load %arg12[%c0_31, %c0_32] : memref<8x32xf32, #tpu.memory_space<vmem>>, vector<8x32xf32>
    %47 = arith.truncf %45 : vector<8x4xf32> to vector<8x4xbf16>
    %cst_33 = arith.constant dense<0.000000e+00> : vector<8x32xf32>
    %48 = tpu.matmul %47, %12, %cst_33 {dimension_numbers = #tpu.dot_dimension_numbers<[1], [0], [0], [1], [0, 0, 1, 1], [], []>} : vector<8x4xbf16>, vector<4x32xbf16>, vector<8x32xf32> -> vector<8x32xf32>
    %49 = arith.addf %46, %48 : vector<8x32xf32>
    %c0_34 = arith.constant 0 : index
    %c0_35 = arith.constant 0 : index
    %50 = vector.load %arg12[%c0_34, %c0_35] : memref<8x32xf32, #tpu.memory_space<vmem>>, vector<8x32xf32>
    tpu.vector_store %arg12[%c0_34, %c0_35], %49 {strides = array<i32>} : memref<8x32xf32, #tpu.memory_space<vmem>>, vector<8x32xf32>,
    %c7_i32 = arith.constant 7 : i32
    %51 = arith.cmpi eq, %arg1, %c7_i32 : i32
    %52 = arith.extui %51 : i1 to i32
    %c0_i32_36 = arith.constant 0 : i32
    %53 = arith.cmpi ne, %52, %c0_i32_36 : i32
    scf.if %53 {
      %c0_37 = arith.constant 0 : index
      %c0_38 = arith.constant 0 : index
      %54 = vector.load %arg12[%c0_37, %c0_38] : memref<8x32xf32, #tpu.memory_space<vmem>>, vector<8x32xf32>
      %c0_39 = arith.constant 0 : index
      %c0_40 = arith.constant 0 : index
      %55 = vector.load %arg10[%c0_39, %c0_40] : memref<1x32xf32, #tpu.memory_space<vmem>>, vector<1x32xf32>
      %56 = vector.broadcast %55 : vector<1x32xf32> to vector<8x32xf32>
      %57 = arith.addf %54, %56 : vector<8x32xf32>
      %c0_41 = arith.constant 0 : index
      %c0_42 = arith.constant 0 : index
      %c0_43 = arith.constant 0 : index
      %58 = vector.load %arg11[%c0_41, %c0_42, %c0_43] : memref<1x8x32xf32, #tpu.memory_space<vmem>>, vector<1x8x32xf32>
      %59 = vector.shape_cast %58 : vector<1x8x32xf32> to vector<8x32xf32>
      %60 = vector.shape_cast %57 : vector<8x32xf32> to vector<1x8x32xf32>
      tpu.vector_store %arg11[%c0_41, %c0_42, %c0_43], %60 {strides = array<i32>} : memref<1x8x32xf32, #tpu.memory_space<vmem>>, vector<1x8x32xf32>,
    } else {
    }
    return
  }
  func.func @transform_0(%arg0: i32, %arg1: i32) -> (i32, i32, i32) {
    %c0_i32 = arith.constant 0 : i32
    %c0_i32_0 = arith.constant 0 : i32
    %c0_i32_1 = arith.constant 0 : i32
    return %arg0, %c0_i32, %c0_i32_0 : i32, i32, i32
  }
  func.func @transform_1(%arg0: i32, %arg1: i32) -> (i32, i32, i32) {
    %c0_i32 = arith.constant 0 : i32
    %c0_i32_0 = arith.constant 0 : i32
    %c0_i32_1 = arith.constant 0 : i32
    return %arg1, %c0_i32, %c0_i32_0 : i32, i32, i32
  }
  func.func @transform_2(%arg0: i32, %arg1: i32) -> (i32, i32, i32) {
    %c0_i32 = arith.constant 0 : i32
    %c0_i32_0 = arith.constant 0 : i32
    %c0_i32_1 = arith.constant 0 : i32
    return %arg1, %c0_i32, %c0_i32_0 : i32, i32, i32
  }
  func.func @transform_3(%arg0: i32, %arg1: i32) -> (i32, i32, i32) {
    %c0_i32 = arith.constant 0 : i32
    %c0_i32_0 = arith.constant 0 : i32
    %c0_i32_1 = arith.constant 0 : i32
    return %arg1, %c0_i32, %c0_i32_0 : i32, i32, i32
  }
  func.func @transform_4(%arg0: i32, %arg1: i32) -> (i32, i32, i32) {
    %c0_i32 = arith.constant 0 : i32
    %c0_i32_0 = arith.constant 0 : i32
    %c0_i32_1 = arith.constant 0 : i32
    return %arg1, %c0_i32, %c0_i32_0 : i32, i32, i32
  }
  func.func @transform_5(%arg0: i32, %arg1: i32) -> (i32, i32, i32) {
    %c0_i32 = arith.constant 0 : i32
    %c0_i32_0 = arith.constant 0 : i32
    %c0_i32_1 = arith.constant 0 : i32
    return %arg1, %c0_i32, %c0_i32_0 : i32, i32, i32
  }
  func.func @transform_6(%arg0: i32, %arg1: i32) -> (i32, i32, i32) {
    %c0_i32 = arith.constant 0 : i32
    %c0_i32_0 = arith.constant 0 : i32
    %c0_i32_1 = arith.constant 0 : i32
    return %arg1, %c0_i32, %c0_i32_0 : i32, i32, i32
  }
  func.func @transform_7(%arg0: i32, %arg1: i32) -> (i32, i32, i32) {
    %c0_i32 = arith.constant 0 : i32
    %c0_i32_0 = arith.constant 0 : i32
    %c0_i32_1 = arith.constant 0 : i32
    return %arg1, %c0_i32, %c0_i32_0 : i32, i32, i32
  }
  func.func @transform_8(%arg0: i32, %arg1: i32) -> (i32, i32) {
    %c0_i32 = arith.constant 0 : i32
    %c0_i32_0 = arith.constant 0 : i32
    %c0_i32_1 = arith.constant 0 : i32
    return %c0_i32, %c0_i32_0 : i32, i32
  }
  func.func @transform_9(%arg0: i32, %arg1: i32) -> (i32, i32, i32) {
    %c0_i32 = arith.constant 0 : i32
    %c0_i32_0 = arith.constant 0 : i32
    %c0_i32_1 = arith.constant 0 : i32
    return %arg0, %c0_i32, %c0_i32_0 : i32, i32, i32
  }
}

</mosaic_0001>

<bundles_post_ra>
// kernel: tpu_custom_call.1
= control target key start
LH: loop header
LB: loop body
LE: loop exit
PB: predicated region body
PF: predicated region fallthrough
CT: control target
= control target key end

     0   :  { %s1531_s0 = inlined_call_operand.vmem [shape: bf16[2,8,32], index: 0, kind: input, shape index: {}]   ;;  %s1532_s1 = inlined_call_operand.vmem [shape: bf16[8,32,4], index: 1, kind: input, shape index: {}]   ;;  %s1533_s2 = inlined_call_operand.vmem [shape: f32[8,1,4], index: 2, kind: input, shape index: {}]   ;;  %s1534_s3 = inlined_call_operand.vmem [shape: bf16[8,32,4], index: 3, kind: input, shape index: {}]   ;;  %s1535_s4 = inlined_call_operand.vmem [shape: f32[8,1,4], index: 4, kind: input, shape index: {}]   ;;  %s1536_s5 = inlined_call_operand.vmem [shape: bf16[8,32,4], index: 5, kind: input, shape index: {}]   ;;  %s1537_s6 = inlined_call_operand.vmem [shape: f32[8,1,4], index: 6, kind: input, shape index: {}]   ;;  %s1538_s7 = inlined_call_operand.vmem [shape: bf16[8,4,32], index: 7, kind: input, shape index: {}]   ;;  %s1539_s8 = inlined_call_operand.vmem [shape: f32[1,32], index: 8, kind: input, shape index: {}]   ;;  %s1540_s9 = inlined_call_operand.hbm [shape: f32[2,8,32], index: 9, kind: output, shape index: {}]  }
   0x1   :  { %1553 = sst [smem:[#allocation16_spill]] %s1531_s0 }
   0x2   :  { %1554 = sst [smem:[#allocation17_spill]] %s1532_s1 }
   0x3   :  { %1555 = sst [smem:[#allocation18_spill]] %s1540_s9 }
   0x4   :  { %14 = vsyncpa [#allocation4], 0 }
   0x5   :  { %16 = vsyncpa [#allocation4 + $0x1], 0  ;;  %s1324_s30 = smov 0   ;;  %s1326_s10 = smov 0  }
   0x6   :  { %s1328_s11 = smov 0   ;;  %s1330_s12 = smov 0  }
   0x7   :  { %s1332_s13 = smov 0   ;;  %s1334_s14 = smov 0  }
   0x8   :  { %s1336_s15 = smov 0   ;;  %s1338_s16 = smov 0  }
   0x9 LB: > { %1556 = sst [smem:[#allocation6_spill]] %s1240_s30  ;;  %s996_s17 = sadd.s32 4294967295, %s1268_s16   ;;  %s1268_s16 = sphi %s1338_s16, %s22_s16   ;;  %s1264_s15 = sphi %s1336_s15, %s1583_s15   ;;  %s1260_s14 = sphi %s1334_s14, %s1582_s14   ;;  %s1256_s13 = sphi %s1332_s13, %s1581_s13   ;;  %s1252_s12 = sphi %s1330_s12, %s1580_s12   ;;  %s1248_s11 = sphi %s1328_s11, %s1579_s11   ;;  %s1244_s10 = sphi %s1326_s10, %s1585_s10   ;;  %s1240_s30 = sphi %s1324_s30, %s1584_s30  }
   0xa   : > { %1557 = sst [smem:[#allocation7_spill]] %s1248_s11  ;;  %s997_s18 = sadd.s32 4294967294, %s1268_s16  }
   0xb   : > { %1558 = sst [smem:[#allocation8_spill]] %s1260_s14  ;;  %s31_s19 = sadd.s32 1, %s1260_s14 }
   0xc   : > { %1559 = sst [smem:[#allocation9_spill]] %s1264_s15  ;;  %p32_p0 = scmp.ge.s32.totalorder %s31_s19, 8 }
   0xd   : > { %1560 = sst [smem:[#allocation10_spill]] %s1268_s16  ;;  %s34_s20 = sadd.s32 1, %s1264_s15 }
   0xe   : > { %p280_p1 = scmp.ne.s32.totalorder %s1248_s11, %s1244_s10  ;;  %p281_p2 = scmp.eq.s32.totalorder %s996_s17, 15 }
   0xf   : > { %s1587_s19 = smov (%p32_p0, %s31_s19), 0  ;;  %s1589_s20 = smov (!%p32_p0, %s34_s20), %s1264_s15 }
  0x10   : > { %1561 = sst [smem:[#allocation11_spill]] %s1587_s19  ;;  %p1373_p3 = por %p281_p2, %p280_p1 }
  0x11   : > { %p286_p4 = scmp.ne.s32.totalorder %s1244_s10, %s1240_s30  ;;  %p36_p5 = scmp.ge.s32.totalorder %s1589_s20, 2 }
  0x12   : > { %s1562_s21 = scalar_select %p1373_p3, 1, 0 }
  0x13   : > { %p287_p6 = scmp.eq.s32.totalorder %s997_s18, 15  ;;  %p1000_p7 = scmp.ge.s32.totalorder %s1268_s16, 1 }
  0x14   : > { %1563 = sst [smem:[#allocation12_spill]] %s1562_s21  ;;  %p364_p8 = scmp.lt.s32.totalorder %s1268_s16, 17 }
  0x15   : > { %s1591_s20 = smov (%p36_p5, %s1589_s20), 0  ;;  %p1383_p9 = por %p287_p6, %p286_p4 }
  0x16   : > { %1564 = sst [smem:[#allocation13_spill]] %s1591_s20  ;;  %p365_p10 = pnand %p1000_p7, %p364_p8 }
  0x17   : > { %s1565_s22 = scalar_select %p1383_p9, 1, 0 }
  0x18   : > { %s267_s23 = ssub.s32 %s1264_s15, %s1591_s20  ;;  %s270_s24 = sadd.s32 1, %s1248_s11 }
  0x19   : > { %1566 = sst [smem:[#allocation14_spill]] %s1565_s22  ;;  %p268_p11 = scmp.eq.s32.totalorder %s267_s23, 0 }
  0x1a   : > { %368 = sbr.rel (%p365_p10) target bundleno = 1197 (0x4ad), region = 56  ;;  %s1542_s26 = sand.u32 (!%p365_p10), 1, %s1244_s10  }
  0x1b   : > { %s1391_s25 = scalar_select %p268_p11, %s1248_s11, %s270_s24  }
  0x1c   : > { %p427_p12 = scmp.lt.s32.totalorder (!%p365_p10), %s1256_s13, 1  ;;  %s1397_s27 = sshll.u32 (!%p365_p10), %s1542_s26, 3 }
  0x1d   : > { %1567 = sst [smem:[#allocation15_spill]] %s1391_s25  ;;  %p431_p13 = scmp.lt.s32.totalorder (!%p365_p10), %s1252_s12, 7 }
  0x1e   : > { %s1568_s0 = sld [smem:[#allocation16_spill]] (!%p365_p10)  ;;  %s426_s30 = scalar_lea.vmem (!%p365_p10), [#allocation3], %s1397_s27 }
  0x1f   : > { %s428_s28 = scalar_select %p427_p12, %s1256_s13, 1 }
  0x20   : > { %s1402_s29 = scalar_select %p431_p13, %s1252_s12, 7 }
  0x21   : > { %s1002_s17 = sshll.u32 %s428_s28, 2  ;;  %s1569_s1 = sld [smem:[#allocation17_spill]] }
  0x22   : > { %s1032_s20 = sshll.u32 %s1402_s29, 4  ;;  %s446_s21 = scalar_lea.vmem %s1535_s4, %s1402_s29 }
  0x23   : > { %s443_s16 = scalar_lea.vmem %s1534_s3, %s1032_s20  ;;  %s1427_s23 = scalar_lea.vmem %s1536_s5, %s1032_s20 }
  0x24   : > { %s1407_s24 = scalar_lea.vmem %s1568_s0, %s1002_s17  ;;  %s454_s26 = scalar_lea.vmem %s1537_s6, %s1402_s29 }
  0x25   : > { %p1010_p0 = scmp.ne.s32.totalorder %s1252_s12, 0 }
  0x27   : > { %s435_s15 = scalar_lea.vmem %s1569_s1, %s1032_s20  ;;  %s1009_s1 = sshll.u32 %s1402_s29, 1 }
  0x28   : > { %s1437_s11 = scalar_lea.vmem %s1538_s7, %s1009_s1  ;;  %463 = sbr.rel (%p1010_p0) target bundleno = 47 (0x2f), region = 60 }
  0x2d   : > { %vm464_vm0 = vcmask 261120   ;;  %v1270_v0 = vmov 0.0  }
  0x2e   : > { %465 = vst.msk [vmem:[#allocation2] sm:$0xff] %vm464_vm0, %v1270_v0 }
  0x2f PF: > { %v1166_v1 = vld [vmem:[%s443_s16 + $0x8] sm:$0xff]   ;;  %v1271_v2 = vmov 0.0   ;;  %v1168_v4 = vld [vmem:[%s443_s16] sm:$0xff]   ;;  %vm1272_vm1 = vmmov 0   ;;  %vm499_vm2 = vcmask 261120   ;;  %vm663_vm3 = vcmask 31744   ;;  %s1570_s16 = scalar_lea.vmem %s1533_s2, %s1402_s29 }
  0x30   : > { %1058 = vmatprep.subr.bf16.mxu1 %v1271_v2  ;;  %1050 = vmatprep.subr.bf16.mxu0 %v1271_v2  ;;  %v1167_v3 = vld [vmem:[%s435_s15 + $0x8] sm:$0xff]   ;;  %v1169_v5 = vld [vmem:[%s435_s15] sm:$0xff]   ;;  %vm710_vm4 = vcmask 64512   ;;  %vm727_vm5 = vcmask 1043456   ;;  %vm777_vm6 = vcmask 1041408   ;;  %p1026_p1 = scmp.ne.s32.totalorder %s1252_s12, 7 }
  0x31   : > { %1059 = vmatpush3.bf16.msra.mxu1 %v1166_v1  ;;  %1062 = vmatprep.mubr.msk.bf16.mxu1 %vm1272_vm1, %v1271_v2  ;;  %v466_v6 = vld [vmem:[%s1407_s24] sm:$0xf]  ;;  %v1170_v22 = vld [vmem:[%s1427_s23 + $0x8] sm:$0xff]  }
  0x32   : > { %1051 = vmatpush3.bf16.msra.mxu0 %v1167_v3  ;;  %1060 = vmatprep.subr.bf16.mxu1 %v1271_v2  ;;  %v1015_v7 = vld [vmem:[%s446_s21] ss:$0 sm:$0xff] }
  0x33   : > { %1052 = vmatprep.subr.bf16.mxu0 %v1271_v2  ;;  %1054 = vmatprep.mubr.msk.bf16.mxu0 %vm1272_vm1, %v1271_v2  ;;  %v1011_v12 = vld [vmem:[%s1570_s16] ss:$0 sm:$0xff] }
  0x34   : > { %v1171_v23 = vld [vmem:[%s1427_s23] sm:$0xff]  }
  0x35   : > { %1061 = vmatpush3.bf16.msra.mxu1 %v1168_v4  ;;  %v1019_v34 = vld [vmem:[%s454_s26] ss:$0 sm:$0xff] }
  0x36   : > { %1053 = vmatpush3.bf16.msra.mxu0 %v1169_v5  ;;  %1074 = vmatprep.subr.bf16.mxu1 %v1271_v2  ;;  %v479_v42 = vld [vmem:[%s1437_s11] sm:$0x3] }
  0x37   : > { %1066 = vmatprep.subr.bf16.mxu0 %v1271_v2  ;;  %v779_v43 = vsel %vm777_vm6, %v479_v42, 0  ;;  %v772_v54 = vld [vmem:[#allocation2] sm:$0xff] }
  0x38   : > { %1063 = vmatmul.mubr.msk.bf16.vlgmr.msra.gmra.mxu1 %vm499_vm2, %v466_v6 }
  0x39   : > { %1055 = vmatmul.mubr.msk.bf16.vlgmr.msra.gmra.mxu0 %vm499_vm2, %v466_v6  ;;  %1076 = vmatprep.mubr.msk.bf16.mxu1 %vm1272_vm1, %v1271_v2 }
  0x3a   : > { %1070 = vmatprep.mubr.msk.bf16.mxu0 %vm1272_vm1, %v1271_v2  ;;  %1067 = vmatpush3.bf16.msra.mxu0 %v1170_v22 }
  0x3b   : > { %1068 = vmatprep.subr.bf16.mxu0 %v1271_v2 }
  0x3e   : > { %1069 = vmatpush3.bf16.msra.mxu0 %v1171_v23 }
  0x3f   : > { %1080 = vmatprep.subr.bf16.mxu0 %v1271_v2 }
  0x41   : > { %1071 = vmatmul.mubr.msk.bf16.vlgmr.msra.gmra.mxu0 %vm499_vm2, %v466_v6 }
  0x42   : > { %1082 = vmatprep.mubr.msk.bf16.mxu0 %vm1272_vm1, %v1271_v2 }
  0xf8   : > { %v596_v8 = vpop.f32.mrf.mxu1 }
  0xf9   : > { %v597_v9 = vadd.f32 %v1015_v7, %v596_v8  ;;  %v537_v10 = vpop.f32.mrf.mxu0 }
  0xfa   : > { %v1064_v11 = vpop.f32.mrf.mxu1  ;;  %v538_v17 = vadd.f32 %v1011_v12, %v537_v10 }
  0xfb   : > { %v662_v13 = vpack.c.bf16 %v597_v9, %v597_v9  ;;  %v1056_v14 = vpop.f32.mrf.mxu0 }
  0xfc   : > { %v599_v15 = vpop.f32.mrf.mxu1  ;;  %v661_v21 = vpack.c.bf16 %v538_v17, %v538_v17 }
  0xfd   : > { %v668_v16 = vsel %vm663_vm3, %v662_v13, 0  ;;  %v540_v18 = vpop.f32.mrf.mxu0 }
  0xfe   : > { %v1065_v19 = vpop.f32.mrf.mxu1  ;;  %1075 = vmatpush3.bf16.xpose.msra.mxu1 %v668_v16 }
  0xff   : > { %v1057_v20 = vpop.f32.mrf.mxu0  ;;  %1086 = vmatprep.subr.bf16.mxu1 %v1271_v2 }
 0x101   : > { %v655_v35 = vpop.f32.mrf.mxu0 }
 0x102   : > { %v656_v36 = vadd.f32 %v1019_v34, %v655_v35 }
 0x103   : > { %v1072_v37 = vpop.f32.mrf.mxu0 }
 0x104   : > { %v723_v38 = vpack.c.bf16 %v656_v36, %v656_v36 }
 0x105   : > { %1077 = vmatmul.mubr.msk.bf16.vlgmr.msra.gmra.mxu1 %vm663_vm3, %v661_v21  ;;  %v658_v39 = vpop.f32.mrf.mxu0 }
 0x106   : > { %1088 = vmatprep.mubr.msk.bf16.mxu1 %vm1272_vm1, %v1271_v2  ;;  %v729_v40 = vsel %vm727_vm5, %v723_v38, 0  ;;  %1087 = vmatpush3.bf16.msra.mxu1 %v779_v43 }
 0x107   : > { %v1073_v41 = vpop.f32.mrf.mxu0  ;;  %1081 = vmatpush3.bf16.msra.mxu0 %v729_v40 }
 0x1c5   : > { %v704_v24 = vpop.f32.mrf.mxu1 }
 0x1c6   : > { %v711_v25 = vsel %vm710_vm4, %v704_v24, -inf }
 0x1c7   : > { %712 = vmax.xlane.f32.xlu0 %v711_v25  ;;  %v1078_v26 = vpop.f32.mrf.mxu1 }
 0x1c9   : > { %v707_v27 = vpop.f32.mrf.mxu1 }
 0x1cb   : > { %v1079_v28 = vpop.f32.mrf.mxu1 }
 0x250   : > { %v713_v29 = vpop.xlane.xlu0 %712 }
 0x251   : > { %v714_v30 = vsub.f32 %v704_v24, %v713_v29 }
 0x253   : > { %v715_v31 = vmul.f32 1.442695, %v714_v30 }
 0x255   : > { %1172 = vpow2.f32 %v715_v31 }
 0x262   : > { %v1173_v32 = vpop.eup %1172 }
 0x263   : > { %v717_v33 = vsel %vm710_vm4, %v1173_v32, 0.0 }
 0x264   : > { %718 = vadd.xlane.f32.xlu0 %v717_v33 }
 0x2ed   : > { %v719_v44 = vpop.xlane.xlu0 %718 }
 0x2ee   : > { %1174 = vrcp.f32 %v719_v44 }
 0x2fb   : > { %v1175_v45 = vpop.eup %1174 }
 0x2fc   : > { %v721_v46 = vmul.f32 %v1175_v45, %v1173_v32 }
 0x2fe   : > { %v722_v47 = vpack.c.bf16 %v721_v46, %v721_v46 }
 0x300   : > { %1083 = vmatmul.mubr.msk.bf16.vlgmr.msra.gmra.mxu0 %vm710_vm4, %v722_v47 }
 0x3c0   : > { %v765_v48 = vpop.f32.mrf.mxu0 }
 0x3c1   : > { %v771_v49 = vmul.f32 0.5, %v765_v48 }
 0x3c2   : > { %v1084_v50 = vpop.f32.mrf.mxu0 }
 0x3c3   : > { %v773_v51 = vpack.c.bf16 %v771_v49, %v771_v49 }
 0x3c4   : > { %v768_v52 = vpop.f32.mrf.mxu0 }
 0x3c5   : > { %1089 = vmatmul.mubr.msk.bf16.vlgmr.msra.gmra.mxu1 %vm663_vm3, %v773_v51 }
 0x3c6   : > { %v1085_v53 = vpop.f32.mrf.mxu0 }
 0x485   : > { %v815_v55 = vpop.f32.mrf.mxu1 }
 0x486   : > { %v821_v56 = vadd.f32 %v815_v55, %v772_v54 }
 0x487   : > { %v1090_v57 = vpop.f32.mrf.mxu1  ;;  %826 = sbr.rel (%p1026_p1) target bundleno = 1171 (0x493), region = 64 }
 0x488   : > { %822 = vst.msk [vmem:[#allocation2] sm:$0xff] %vm499_vm2, %v821_v56 }
 0x489   : > { %v818_v58 = vpop.f32.mrf.mxu1 }
 0x48b   : > { %v1091_v59 = vpop.f32.mrf.mxu1 }
 0x48c   : > { %v1027_v61 = vld [vmem:[%s1539_s8] ss:$0 sm:$0xff] }
 0x48f   : > { %v827_v60 = vld [vmem:[#allocation2] sm:$0xff] }
 0x490   : > { %v835_v62 = vadd.f32 %v1027_v61, %v827_v60 }
 0x492   : > { %836 = vst.msk [vmem:[%s426_s30] sm:$0xff] %vm499_vm2, %v835_v62 }
 0x493 PF: > { %s1029_s24 = sshll.u32 %s1256_s13, 7  ;;  %s1572_s12 = sld [smem:[#allocation18_spill]] }
 0x494   : > { %s851_s19 = sshll.u32 %s426_s30, 4  ;;  %s1574_s26 = sand.u32 1, %s1244_s10   ;;  %s852_s19 = int_to_ptr.vmem [resolvable:$true] %s851_s19 }
 0x495   : > { %s838_s14 = scalar_lea.sflag [#allocation4], %s1574_s26  ;;  %s1176_s25 = scalar_lea.vmem %s852_s19, 128 }
 0x496   : > { %p1177_p2 = scmp.ne.s32.totalorder %s852_s19, %s1176_s25  ;;  %s1273_s0 = smov [#allocation3]  }
 0x497   : > { %s1180_s1 = sshll.u32 %s1273_s0, 4  ;;  %s1181_s1 = int_to_ptr.vmem [resolvable:$false] %s1180_s1 }
 0x498   : > { %p1178_p4 = pnand %p1177_p2, %p1373_p3  ;;  %s1182_s9 = scalar_lea.vmem %s1181_s1, 256 }
 0x499   : > { %s1573_s17 = smov %s1572_s12  ;;  %s849_s23 = scalar_lea.hbm %s1572_s12, %s1029_s24 }
 0x49a   : > { %p1179_p5 = pneg %p1178_p4  ;;  %p1183_p6 = scmp.lt.s32.totalorder %s852_s19, %s1181_s1 }
 0x49b   : > { %p1184_p7 = scmp.lt.s32.totalorder %s1182_s9, %s1176_s25 }
 0x49d   : > { %p1185_p8 = por %p1184_p7, %p1183_p6 }
 0x49f   : > { %p1186_p10 = pnand %p1185_p8, %p1179_p5 }
 0x4a1   : > { %1189 = shalt.err (!%p1186_p10)
}
 0x4a2   : > { %s1190_s13 = scalar_lea.hbm %s849_s23, 128  ;;  %s1194_s15 = scalar_lea.hbm %s1573_s17, 256 }
 0x4a3   : > { %p1191_p11 = scmp.ne.s32.totalorder %s849_s23, %s1190_s13  ;;  %p1195_p0 = scmp.lt.s32.totalorder %s849_s23, %s1573_s17 }
 0x4a4   : > { %p1196_p1 = scmp.lt.s32.totalorder %s1194_s15, %s1190_s13 }
 0x4a5   : > { %p1192_p12 = pnand %p1191_p11, %p1373_p3 }
 0x4a6   : > { %p1197_p2 = por %p1196_p1, %p1195_p0 }
 0x4a7   : > { %p1193_p13 = pneg %p1192_p12 }
 0x4a9   : > { %p1198_p4 = pnand %p1197_p2, %p1193_p13 }
 0x4ab   : > { %1201 = shalt.err (!%p1198_p4)
}
 0x4ac   : > { %1092 = dma.vmem_to_hbm [thread:$0]  (%p1373_p3), %s852_s19, 128, %s849_s23, %s838_s14  }
 0x4ad PF: > { %s1575_s21 = sld [smem:[#allocation10_spill]] }
 0x4ae   : > { %s1576_s11 = sld [smem:[#allocation6_spill]] }
 0x4b3   : > { %p1098_p5 = scmp.ge.s32.totalorder %s1575_s21, 2 }
 0x4b4   : > { %s863_s24 = sand.u32 1, %s1576_s11  }
 0x4b5   : > { %p1095_p6 = pnand %p1098_p5, %p1383_p9  ;;  %s864_s28 = scalar_lea.sflag [#allocation4], %s863_s24 }
 0x4b7   : > { %p1096_p7 = pneg %p1095_p6 }
 0x4b9   : > { %1235 = dma.done.wait (%p1096_p7), %s864_s28, 128  }
 0x4ba   : > { %1237 = vsyncadd (%p1096_p7), %s864_s28, 4294967168  ;;  %s22_s16 = sadd.s32 1, %s1575_s21   ;;  %s1578_s18 = sld [smem:[#allocation7_spill]] }
 0x4bb   : > { %p19_p8 = scmp.ge.s32.totalorder %s22_s16, 18   ;;  %s1579_s11 = sld [smem:[#allocation15_spill]] }
 0x4bc   : > { %s1580_s12 = sld [smem:[#allocation8_spill]]  ;;  %s1584_s30 = smov %s1244_s10 }
 0x4bd   : > { %s1581_s13 = sld [smem:[#allocation9_spill]]  ;;  %21 = sbr.rel (!%p19_p8) target bundleno = 9 (0x9), region = 120 }
 0x4be   : > { %s1582_s14 = sld [smem:[#allocation11_spill]] }
 0x4bf   : > { %s1583_s15 = sld [smem:[#allocation13_spill]] }
 0x4c0   : > { %s1585_s10 = smov %s1578_s18 }
 0x4c2   :  { %869 = vsyncpa [#allocation4], 1 }
 0x4c3   :  { %871 = vsyncpa [#allocation4 + $0x1], 1 }

</bundles_post_ra>
